<compile_context>
chip_gen: v5e
topology: v5e:2x2
jax: 0.10.0
libtpu: 0.0.40
codegen_flags: <defaults>
</compile_context>

<pallas_src>
import math

import jax
import jax.numpy as jnp
from jax.experimental import pallas as pl
from jax.experimental.pallas import tpu as pltpu


# ---------------------------------------------------------------------------
# Constants / tiling policy
# ---------------------------------------------------------------------------

_LANE = 128
_TARGET_C = 512                              # lane width on the ~85% HBM-roofline plateau
_VMEM_COPY_TILE_BYTES = 2 * 1024 * 1024      # single copy: 2 in/out bufs x2 = 4 bufs <= 8 MiB
_VMEM_PAIR_TILE_BYTES = 3 * 512 * 1024       # fused pair: 4 f32 bufs + 4 int8 bufs <= ~7.5 MiB
_VMEM_LIMIT_BYTES = 32 * 1024 * 1024         # explicit limit, <= v7x scoped default
_DMA_CHUNK_ALIGN = 1024                      # elements; keeps HBM->HBM chunk offsets aligned


def _sublane_pack(itemsize):
    # f32 -> 8, bf16 -> 16, int8 -> 32
    return max(8, 32 // max(1, itemsize))


def _factor_rc(total, target_c=_TARGET_C):
    """Lane-dense (R, C) view of a flat buffer: C | total, C % 128 == 0, C <= target_c."""
    if total < _LANE or total % _LANE != 0:
        return None
    c = min(target_c, total)
    c -= c % _LANE
    while c >= _LANE:
        if total % c == 0:
            return total // c, c
        c -= _LANE
    return None  # unreachable when total % 128 == 0


def _pick_row_tile(R, C, itemsize, budget_bytes, target_steps=8, pack=None):
    """Row-tile: multiple of the sublane pack, bounded by a real byte budget,
    small enough to give >= target_steps grid steps when data allows."""
    if pack is None:
        pack = _sublane_pack(itemsize)
    if R <= pack:
        return R                                    # full dim: always legal, nothing to pad
    row_bytes = C * itemsize
    budget_rows = max(pack, (budget_bytes // row_bytes) // pack * pack)
    steps_rows = max(pack, (-(-R // target_steps)) // pack * pack)
    tile = min(budget_rows, steps_rows)
    if tile >= R:
        return R
    return tile


# ---------------------------------------------------------------------------
# Pallas kernels
# ---------------------------------------------------------------------------

def _copy_kernel(x_ref, o_ref):
    # Lane-dense (TILE_R, C) block copy; hook point for future fused math.
    o_ref[...] = x_ref[...]


def _copy2_kernel(q_ref, r_ref, oq_ref, or_ref):
    # Fused copy for the quantized branch: q (int8) and r (f32) share the grid.
    oq_ref[...] = q_ref[...]
    or_ref[...] = r_ref[...]


def _pallas_flatten_copy_2d(x):
    """Tiled VMEM copy of the whole buffer via a lane-dense (R, C) view.

    Returns the (R, C) output (caller reshapes, free), or None if the total
    element count is not a multiple of 128 (no lane-dense view exists).
    """
    total = x.size
    rc = _factor_rc(total)
    if rc is None:
        return None
    R, C = rc
    x2d = x.reshape(R, C)                            # metadata-only
    itemsize = jnp.dtype(x.dtype).itemsize
    tile_r = _pick_row_tile(R, C, itemsize, _VMEM_COPY_TILE_BYTES)
    grid = (pl.cdiv(R, tile_r),)
    return pl.pallas_call(
        _copy_kernel,
        out_shape=jax.ShapeDtypeStruct((R, C), x.dtype),
        grid_spec=pltpu.PrefetchScalarGridSpec(
            num_scalar_prefetch=0,
            grid=grid,
            in_specs=[pl.BlockSpec((tile_r, C), lambda i: (i, 0))],
            out_specs=pl.BlockSpec((tile_r, C), lambda i: (i, 0)),
        ),
        compiler_params=pltpu.CompilerParams(
            dimension_semantics=("parallel",),
            vmem_limit_bytes=_VMEM_LIMIT_BYTES),
        cost_estimate=pl.CostEstimate(
            flops=0, transcendentals=0,
            bytes_accessed=2 * total * itemsize),
    )(x2d)


def _pallas_flatten_copy_pair_2d(q, r):
    """Fused tiled VMEM copy of q (int) and r (float) in one pallas_call.

    Row tile is a multiple of BOTH sublane packs (lcm, i.e. 32 for int8+f32)
    so neither stream is sublane padded; bytes budgeted against the wider dtype.
    Returns (q2d_out, r2d_out) or None for ragged totals.
    """
    assert q.shape == r.shape
    total = q.size
    rc = _factor_rc(total)
    if rc is None:
        return None
    R, C = rc
    q2d = q.reshape(R, C)
    r2d = r.reshape(R, C)
    it_q = jnp.dtype(q.dtype).itemsize
    it_r = jnp.dtype(r.dtype).itemsize
    pack = max(_sublane_pack(it_q), _sublane_pack(it_r))       # packs are powers of 2 -> lcm
    tile_r = _pick_row_tile(R, C, max(it_q, it_r), _VMEM_PAIR_TILE_BYTES, pack=pack)
    grid = (pl.cdiv(R, tile_r),)
    spec = pl.BlockSpec((tile_r, C), lambda i: (i, 0))
    return pl.pallas_call(
        _copy2_kernel,
        out_shape=(jax.ShapeDtypeStruct((R, C), q.dtype),
                   jax.ShapeDtypeStruct((R, C), r.dtype)),
        grid_spec=pltpu.PrefetchScalarGridSpec(
            num_scalar_prefetch=0,
            grid=grid,
            in_specs=[spec, spec],
            out_specs=[spec, spec],
        ),
        compiler_params=pltpu.CompilerParams(
            dimension_semantics=("parallel",),
            vmem_limit_bytes=_VMEM_LIMIT_BYTES),
        cost_estimate=pl.CostEstimate(
            flops=0, transcendentals=0,
            bytes_accessed=2 * total * (it_q + it_r)),
    )(q2d, r2d)


def _make_dma_chunks(total, n_target=4, align=_DMA_CHUNK_ALIGN):
    """Static, aligned chunk list for the HBM->HBM DMA copy."""
    if total <= 2 * align:
        return [(0, total)]
    n = min(n_target, max(1, total // align))
    per = -(-total // n)
    per = ((per + align - 1) // align) * align
    chunks, start = [], 0
    while start < total:
        size = min(per, total - start)
        chunks.append((start, size))
        start += size
    return chunks


def _dma_flat_copy(x_flat):
    """Pure HBM->HBM chunked DMA copy of a 1-D array (no VMEM round trip)."""
    total = x_flat.shape[0]
    itemsize = jnp.dtype(x_flat.dtype).itemsize
    chunks = _make_dma_chunks(total)

    def kernel(x_ref, o_ref, sems):
        if len(chunks) == 1:
            cp = pltpu.make_async_copy(x_ref, o_ref, sems.at[0])
            cp.start()
            cp.wait()
        else:
            for idx, (st, sz) in enumerate(chunks):
                pltpu.make_async_copy(x_ref.at[pl.ds(st, sz)],
                                      o_ref.at[pl.ds(st, sz)],
                                      sems.at[idx]).start()
            for idx, (st, sz) in enumerate(chunks):
                pltpu.make_async_copy(x_ref.at[pl.ds(st, sz)],
                                      o_ref.at[pl.ds(st, sz)],
                                      sems.at[idx]).wait()

    return pl.pallas_call(
        kernel,
        out_shape=jax.ShapeDtypeStruct((total,), x_flat.dtype),
        in_specs=[pl.BlockSpec(memory_space=pl.ANY)],
        out_specs=pl.BlockSpec(memory_space=pl.ANY),
        scratch_shapes=[pltpu.SemaphoreType.DMA((len(chunks),))],
        compiler_params=pltpu.CompilerParams(
            vmem_limit_bytes=_VMEM_LIMIT_BYTES),
        cost_estimate=pl.CostEstimate(
            flops=0, transcendentals=0,
            bytes_accessed=2 * total * itemsize),
    )(x_flat)


# ---------------------------------------------------------------------------
# Flatten shape plumbing (pure metadata)
# ---------------------------------------------------------------------------

def _norm_dim(d, ndim):
    return d % ndim if d < 0 else d


def _flatten_target_shape(shape, start_dim, end_dim):
    nd = len(shape)
    s = _norm_dim(start_dim, nd)
    e = _norm_dim(end_dim, nd)
    merged = math.prod(shape[s:e + 1])
    return shape[:s] + (merged,) + shape[e + 1:]


# ---------------------------------------------------------------------------
# Module port
# ---------------------------------------------------------------------------

class QuantizedTensor:
    def __init__(self, q, s, z, r=None):
        self.q, self.s, self.z, self.r = q, s, z, r

    def dequantize(self):
        if self.r is not None:
            return self.r
        return self.s * (self.q.astype(jnp.int32) - self.z)

    @property
    def shape(self):
        return self.q.shape


class QuantizedFlatten:
    """JAX/Pallas port of the PyTorch QuantizedFlatten module.

    copy_mode:
      "view" (default) — metadata-only reshape (flatten of a contiguous tensor
                         is free; fastest possible, zero HBM traffic).
      "dma"            — chunked HBM->HBM DMA copy (no VMEM round trip); the
                         right opt-in copy while no math is fused.
      "vmem"           — lane-dense (R, C) row-tiled copy through VMEM; the
                         hook for future fused quant/dequant math.
    """

    def __init__(self, start_dim, end_dim=-1, copy_mode="view"):
        assert copy_mode in ("view", "dma", "vmem")
        self.start_dim = start_dim
        self.end_dim = end_dim
        self.copy_mode = copy_mode
        self.activation_quantization = False
        # Buffers from QuantizedOperator.__init__ (not read in forward()).
        self.momentum = 0.1
        self.running_min = jnp.zeros((1,), jnp.float32)
        self.running_max = jnp.zeros((1,), jnp.float32)
        self.num_batches_tracked = jnp.zeros((), jnp.int32)
        # TODO(synk): update_min_max_stats / quantize_output are training-time
        # helpers never invoked by QuantizedFlatten.forward; not lowered here.

    # -- single-tensor flatten ------------------------------------------------
    def _flatten(self, x):
        target = _flatten_target_shape(x.shape, self.start_dim, self.end_dim)
        if self.copy_mode == "view":
            return x.reshape(target)                     # free view, zero HBM traffic
        if self.copy_mode == "dma":
            return _dma_flat_copy(x.reshape(-1)).reshape(target)
        out2d = _pallas_flatten_copy_2d(x)               # "vmem" fusion-hook path
        if out2d is None:
            # TODO(synk): totals not divisible by 128 have no lane-dense (R, C)
            # view; fall back to the (exact) metadata-only reshape.
            return x.reshape(target)
        return out2d.reshape(target)

    # -- fused q/r flatten ----------------------------------------------------
    def _flatten_pair(self, q, r):
        target = _flatten_target_shape(q.shape, self.start_dim, self.end_dim)
        if self.copy_mode == "view":
            return q.reshape(target), r.reshape(target)
        if self.copy_mode == "dma":
            return (_dma_flat_copy(q.reshape(-1)).reshape(target),
                    _dma_flat_copy(r.reshape(-1)).reshape(target))
        pair = _pallas_flatten_copy_pair_2d(q, r)
        if pair is None:
            return q.reshape(target), r.reshape(target)
        oq, orr = pair
        return oq.reshape(target), orr.reshape(target)

    def __call__(self, x):
        if self.activation_quantization:
            assert isinstance(x, QuantizedTensor)
            if x.r is None:
                # torch reference assumes r is present; handle None gracefully.
                return QuantizedTensor(self._flatten(x.q), x.s, x.z, None)
            q, r = self._flatten_pair(x.q, x.r)
            return QuantizedTensor(q, x.s, x.z, r)
        return self._flatten(x)


if __name__ == "__main__":
    key = jax.random.PRNGKey(0)
    k_x, k_q, k_r, k_y = jax.random.split(key, 4)

    N, C, H, W = 2, 4, 16, 16
    x = jax.random.normal(k_x, (N, C, H, W), dtype=jnp.float32)
    ref = x.reshape(N, C * H * W)

    # 1) Default path: metadata-only reshape (no kernel, no HBM traffic).
    out_view = jax.block_until_ready(QuantizedFlatten(1)(x))
    assert out_view.shape == (N, C * H * W) and out_view.dtype == x.dtype
    assert bool(jnp.array_equal(out_view, ref)), "reshape flatten mismatch"

    # 2) VMEM row-tiled Pallas copy (fusion hook) — bit-exact vs reference.
    out_vmem = jax.block_until_ready(QuantizedFlatten(1, copy_mode="vmem")(x))
    assert out_vmem.shape == (N, C * H * W) and out_vmem.dtype == x.dtype
    assert bool(jnp.array_equal(out_vmem, ref)), "vmem flatten mismatch"

    # 3) Pure HBM->HBM DMA copy path.
    out_dma = jax.block_until_ready(QuantizedFlatten(1, copy_mode="dma")(x))
    assert out_dma.shape == (N, C * H * W) and out_dma.dtype == x.dtype
    assert bool(jnp.array_equal(out_dma, ref)), "dma flatten mismatch"

    # 4) Shape with a multi-step grid and a masked partial tail block
    #    (total=3840 -> (R=10, C=384), tile_r=8, grid=(2,), tail = 2 rows).
    y = jax.random.normal(k_y, (2, 5, 24, 16), dtype=jnp.float32)
    y_ref = y.reshape(2, -1)
    out_y = jax.block_until_ready(QuantizedFlatten(1, copy_mode="vmem")(y))
    assert bool(jnp.array_equal(out_y, y_ref)), "vmem tail-block flatten mismatch"
    out_yd = jax.block_until_ready(QuantizedFlatten(1, copy_mode="dma")(y))
    assert bool(jnp.array_equal(out_yd, y_ref)), "dma multi-chunk flatten mismatch"

    # 5) Ragged total (not a multiple of 128) -> graceful reshape fallback.
    z = jax.random.normal(k_y, (2, 3, 5, 7), dtype=jnp.float32)
    out_z = jax.block_until_ready(QuantizedFlatten(1, copy_mode="vmem")(z))
    assert bool(jnp.array_equal(out_z, z.reshape(2, -1))), "ragged fallback mismatch"

    # 6) Quantized branch: fused q/r flatten in a single pallas_call.
    q = jax.random.randint(k_q, (N, C, H, W), -128, 128, dtype=jnp.int8)
    r = jax.random.normal(k_r, (N, C, H, W), dtype=jnp.float32)
    mod_q = QuantizedFlatten(1, copy_mode="vmem")
    mod_q.activation_quantization = True
    out_qt = mod_q(QuantizedTensor(q, jnp.float32(0.05), jnp.int8(3), r))
    jax.block_until_ready((out_qt.q, out_qt.r))
    assert out_qt.q.shape == (N, C * H * W) and out_qt.r.shape == (N, C * H * W)
    assert bool(jnp.array_equal(out_qt.q, q.reshape(N, -1))), "quantized q mismatch"
    assert bool(jnp.array_equal(out_qt.r, r.reshape(N, -1))), "quantized r mismatch"

    print("KERNEL_OK")
</pallas_src>

<mosaic_0001>
module attributes {stable_mosaic.version = 11 : i64} {
  func.func @_copy_kernel(%arg0: i32, %arg1: memref<4x512xf32, #tpu.memory_space<vmem>>, %arg2: memref<4x512xf32, #tpu.memory_space<vmem>>) attributes {dimension_semantics = [#tpu.dimension_semantics<parallel>], iteration_bounds = array<i64: 1>, scalar_prefetch = 0 : i64, scratch_operands = 0 : i64, tpu.core_type = #tpu.core_type<tc>, window_params = [{transform_indices = @transform_0, window_bounds = array<i64: 4, 512>}, {transform_indices = @transform_1, window_bounds = array<i64: 4, 512>}]} {
    %c0 = arith.constant 0 : index
    %c0_0 = arith.constant 0 : index
    %0 = vector.load %arg1[%c0, %c0_0] : memref<4x512xf32, #tpu.memory_space<vmem>>, vector<4x512xf32>
    %c0_1 = arith.constant 0 : index
    %c0_2 = arith.constant 0 : index
    %1 = vector.load %arg2[%c0_1, %c0_2] : memref<4x512xf32, #tpu.memory_space<vmem>>, vector<4x512xf32>
    tpu.vector_store %arg2[%c0_1, %c0_2], %0 {strides = array<i32>} : memref<4x512xf32, #tpu.memory_space<vmem>>, vector<4x512xf32>,
    return
  }
  func.func @transform_0(%arg0: i32) -> (i32, i32) {
    %c0_i32 = arith.constant 0 : i32
    %c0_i32_0 = arith.constant 0 : i32
    return %arg0, %c0_i32 : i32, i32
  }
  func.func @transform_1(%arg0: i32) -> (i32, i32) {
    %c0_i32 = arith.constant 0 : i32
    %c0_i32_0 = arith.constant 0 : i32
    return %arg0, %c0_i32 : i32, i32
  }
}

</mosaic_0001>

<bundles_post_ra>
// kernel: tpu_custom_call.1
= control target key start
LH: loop header
LB: loop body
LE: loop exit
PB: predicated region body
PF: predicated region fallthrough
CT: control target
= control target key end

     0   :  { %6 = vsyncpa [#allocation3], 0  ;;  %s116_s0 = inlined_call_operand.hbm [shape: f32[4,512], index: 0, kind: input, shape index: {}]   ;;  %s117_s1 = inlined_call_operand.hbm [shape: f32[4,512], index: 1, kind: output, shape index: {}]  }
   0x1   :  { %7 = vsyncpa [#allocation4], 0  ;;  %s13_s8 = sshll.u32 %s116_s0, 4  ;;  %s98_s9 = smov [#allocation2]   ;;  %s14_s8 = int_to_ptr.hbm [resolvable:$true] %s13_s8 }
   0x2   :  { %s15_s10 = sshll.u32 %s98_s9, 4  ;;  %s16_s10 = int_to_ptr.vmem [resolvable:$true] %s15_s10 }
   0x3   :  { %18 = dma.hbm_to_vmem [thread:$0]  %s14_s8, 256, %s16_s10, [#allocation3]  }
   0x4   :  { %94 = dma.done.wait [#allocation3], 256  }
   0x5   :  { %95 = vsyncadd [#allocation3], 4294967040  ;;  %s99_s11 = smov [#allocation5]   ;;  %s34_s15 = sshll.u32 %s117_s1, 4  ;;  %v23_v0 = vld [vmem:[#allocation2] sm:$0xff]  ;;  %v24_v1 = vld [vmem:[#allocation2 + $0x8] sm:$0xff]  ;;  %s35_s15 = int_to_ptr.hbm [resolvable:$true] %s34_s15 }
   0x6   :  { %s32_s12 = sshll.u32 %s99_s11, 4  ;;  %25 = vst [vmem:[#allocation5] sm:$0xff] %v23_v0  ;;  %s33_s12 = int_to_ptr.vmem [resolvable:$true] %s32_s12 }
   0x7   :  { %26 = vst [vmem:[#allocation5 + $0x8] sm:$0xff] %v24_v1 }
   0x8   :  { %37 = dma.vmem_to_hbm [thread:$0]  %s33_s12, 256, %s35_s15, [#allocation4]  }
   0x9   :  { %96 = dma.done.wait [#allocation4], 256  }
   0xa   :  { %97 = vsyncadd [#allocation4], 4294967040 }
   0xb   :  { %42 = vsyncpa [#allocation3], 1 }
   0xc   :  { %43 = vsyncpa [#allocation4], 1 }

</bundles_post_ra>
